<compile_context>
chip_gen: v5e
topology: v5e:2x2
jax: 0.10.0
libtpu: 0.0.40
codegen_flags: <defaults>
</compile_context>

<pallas_src>
import jax
import jax.numpy as jnp
from jax.experimental import pallas as pl
from jax.experimental.pallas import tpu as pltpu

H3_PAD = 128    # fc3 output 64 padded to a full lane width
C_PAD = 128     # class dim 10 padded to a full lane width (lane-dense store)
NEG = -1e30     # padded-class bias -> exp() underflows to 0, no NaNs


def mlp_kernel(x_ref,
               w1_ref, b1_ref,
               w2_ref, b2_ref,
               w3_ref, b3_ref,
               w4_ref, b4_ref,
               o_ref):
    """Fused 4-layer MLP + log_softmax for one batch tile.

    x arrives as f32 and is cast to bf16 on the VPU right before the fc1 dot
    (bf16 operands, f32 MXU accumulation).  Logits stay f32 through the
    softmax so the -1e30 padded-class bias is exact (no NaN/Inf in real rows).
    """
    x = x_ref[...].astype(jnp.bfloat16)                              # (TB, 784)

    h1 = jnp.dot(x, w1_ref[...], preferred_element_type=jnp.float32)
    h1 = jnp.maximum(h1 + b1_ref[...], 0.0).astype(jnp.bfloat16)     # (TB, 256)

    h2 = jnp.dot(h1, w2_ref[...], preferred_element_type=jnp.float32)
    h2 = jnp.maximum(h2 + b2_ref[...], 0.0).astype(jnp.bfloat16)     # (TB, 128)

    h3 = jnp.dot(h2, w3_ref[...], preferred_element_type=jnp.float32)
    h3 = jnp.maximum(h3 + b3_ref[...], 0.0).astype(jnp.bfloat16)     # (TB, 128)

    logits = jnp.dot(h3, w4_ref[...], preferred_element_type=jnp.float32)
    logits = logits + b4_ref[...]                                    # (TB, 128) f32
    # Padded classes carry bias -1e30 -> exp(shifted) == 0, so log_softmax over
    # the 128-wide (lane-dense) row equals log_softmax over the real 10 classes.
    m = jnp.max(logits, axis=-1, keepdims=True)
    shifted = logits - m
    lse = jnp.log(jnp.sum(jnp.exp(shifted), axis=-1, keepdims=True))
    o_ref[...] = (shifted - lse).astype(o_ref.dtype)                 # bf16 store


def _round_up(n, m):
    return ((n + m - 1) // m) * m


def prepare_params(params):
    """One-time weight prep: (out,in)->(in,out) transpose, lane-pad, bf16 cast.

    Hoisted out of the per-call wrapper so small-batch / latency-sensitive
    invocations don't repeat ~10 small XLA ops per forward.
    """
    (w1, b1), (w2, b2), (w3, b3), (w4, b4) = params
    w1t = w1.T.astype(jnp.bfloat16)                                          # (784, 256)
    w2t = w2.T.astype(jnp.bfloat16)                                          # (256, 128)
    w3t = jnp.pad(w3.T.astype(jnp.float32),
                  ((0, 0), (0, H3_PAD - 64))).astype(jnp.bfloat16)           # (128, 128)
    w4t = jnp.pad(w4.T.astype(jnp.float32),
                  ((0, H3_PAD - 64), (0, C_PAD - 10))).astype(jnp.bfloat16)  # (128, 128)

    b1r = b1[None, :].astype(jnp.float32)                                    # (1, 256)
    b2r = b2[None, :].astype(jnp.float32)                                    # (1, 128)
    b3r = jnp.pad(b3[None, :].astype(jnp.float32), ((0, 0), (0, H3_PAD - 64)))
    b4r = jnp.pad(b4[None, :].astype(jnp.float32), ((0, 0), (0, C_PAD - 10)),
                  constant_values=NEG)                                       # (1, 128)
    return (w1t, b1r, w2t, b2r, w3t, b3r, w4t, b4r)


def classifier_forward(x_nchw, prepared, *, batch_tile=1024):
    """Runs the fused Pallas MLP.

    x_nchw: (B, 1, 28, 28) float32 -- streamed into the kernel untouched
    (only a metadata reshape to (B, 784)).  prepared: output of prepare_params.
    Returns (B, 10) bf16 log-probabilities.
    """
    B = x_nchw.shape[0]
    x = x_nchw.reshape(B, 784)            # == x.view(B, -1); no pad, no cast

    # Batch tile: multiple of 16 (bf16 sublane packing), capped near B.
    tb = min(_round_up(batch_tile, 16), _round_up(B, 16))
    # v7x has two TensorCores: when the batch is big enough keep >= 2 grid
    # steps so dimension_semantics=("parallel",) can shard across them.
    if B >= 64 and pl.cdiv(B, tb) < 2:
        tb = _round_up(pl.cdiv(B, 2), 16)
    grid = (pl.cdiv(B, tb),)

    w1t, b1r, w2t, b2r, w3t, b3r, w4t, b4r = prepared

    # Weights/biases never change across the grid -> single-buffer them.
    def const_spec(shape):
        return pl.BlockSpec(shape, lambda i: (0, 0), pipeline_mode=pl.Buffered(1))

    bp = grid[0] * tb
    flops = 2 * bp * (784 * 256 + 256 * 128 + 128 * H3_PAD + H3_PAD * C_PAD)
    bytes_accessed = (x.size * 4
                      + (w1t.size + w2t.size + w3t.size + w4t.size) * 2
                      + (b1r.size + b2r.size + b3r.size + b4r.size) * 4
                      + B * C_PAD * 2)

    out = pl.pallas_call(
        mlp_kernel,
        out_shape=jax.ShapeDtypeStruct((B, C_PAD), jnp.bfloat16),
        grid_spec=pltpu.PrefetchScalarGridSpec(
            num_scalar_prefetch=0,
            grid=grid,
            in_specs=[
                # x tile, auto-pipelined.
                # TODO(synk): sweep pipeline_mode=pl.Buffered(3) here if a
                # profile shows exposed DMA on the x stream (likeliest on v7x).
                pl.BlockSpec((tb, 784), lambda i: (i, 0)),
                const_spec((784, 256)),      const_spec((1, 256)),      # fc1
                const_spec((256, 128)),      const_spec((1, 128)),      # fc2
                const_spec((128, H3_PAD)),   const_spec((1, H3_PAD)),   # fc3
                const_spec((H3_PAD, C_PAD)), const_spec((1, C_PAD)),    # fc4
            ],
            out_specs=pl.BlockSpec((tb, C_PAD), lambda i: (i, 0)),
        ),
        compiler_params=pltpu.CompilerParams(
            dimension_semantics=("parallel",),
            # Explicit scoped-VMEM budget: tiles up to tb~2048 still fit on
            # v5e (default scoped limit there is only 16 MiB).
            vmem_limit_bytes=32 * 1024 * 1024),
        cost_estimate=pl.CostEstimate(
            flops=int(flops),
            transcendentals=int(bp * C_PAD),
            bytes_accessed=int(bytes_accessed)),
    )(x, w1t, b1r, w2t, b2r, w3t, b3r, w4t, b4r)

    # Drop the 118 padded class columns (batch is exact: no batch padding).
    # TODO(synk): if the consumer is a loss, feed it the padded (B,128) block
    # and index the 10 real classes there to avoid this extra slice pass.
    return out[:, :10]


def init_params(key):
    """Deterministic init matching nn.Linear shapes (uniform +-1/sqrt(fan_in))."""
    dims = [(784, 256), (256, 128), (128, 64), (64, 10)]
    params = []
    for (fan_in, fan_out) in dims:
        key, kw, kb = jax.random.split(key, 3)
        bound = 1.0 / jnp.sqrt(fan_in)
        w = jax.random.uniform(kw, (fan_out, fan_in), jnp.float32, -bound, bound)
        b = jax.random.uniform(kb, (fan_out,), jnp.float32, -bound, bound)
        params.append((w, b))
    return params


def reference_forward(x_nchw, params):
    """Plain-JAX f32 reference mirroring the PyTorch forward."""
    x = x_nchw.reshape(x_nchw.shape[0], -1)
    (w1, b1), (w2, b2), (w3, b3), (w4, b4) = params
    x = jax.nn.relu(x @ w1.T + b1)
    x = jax.nn.relu(x @ w2.T + b2)
    x = jax.nn.relu(x @ w3.T + b3)
    x = jax.nn.log_softmax(x @ w4.T + b4, axis=1)
    return x


if __name__ == "__main__":
    key = jax.random.PRNGKey(0)
    kx, kp = jax.random.split(key)
    params = init_params(kp)
    prepared = prepare_params(params)   # one-time weight prep

    # Single-tile case (B=16 -> one grid step, exact block).
    B = 16
    x = jax.random.normal(kx, (B, 1, 28, 28), dtype=jnp.float32)
    out = jax.block_until_ready(classifier_forward(x, prepared))
    ref = reference_forward(x, params)
    assert out.shape == (B, 10)
    # bf16 operands / bf16 output -> looser tolerance than the f32 reference
    # (deliberate precision trade-off for inference).
    err = jnp.max(jnp.abs(out.astype(jnp.float32) - ref))
    assert jnp.allclose(out.astype(jnp.float32), ref, atol=5e-2, rtol=5e-2), (
        f"max abs err = {err}")

    # Multi-step grid + ragged last block (B=40, tile=16 -> grid of 3).
    B2 = 40
    x2 = jax.random.normal(kx, (B2, 1, 28, 28), dtype=jnp.float32)
    out2 = jax.block_until_ready(classifier_forward(x2, prepared, batch_tile=16))
    ref2 = reference_forward(x2, params)
    assert out2.shape == (B2, 10)
    err2 = jnp.max(jnp.abs(out2.astype(jnp.float32) - ref2))
    assert jnp.allclose(out2.astype(jnp.float32), ref2, atol=5e-2, rtol=5e-2), (
        f"max abs err = {err2}")

    print("KERNEL_OK")
</pallas_src>

<mosaic_0001>
module attributes {stable_mosaic.version = 11 : i64} {
  func.func @mlp_kernel(%arg0: i32, %arg1: memref<16x784xf32, #tpu.memory_space<vmem>>, %arg2: memref<784x256xbf16, #tpu.memory_space<vmem>>, %arg3: memref<1x256xf32, #tpu.memory_space<vmem>>, %arg4: memref<256x128xbf16, #tpu.memory_space<vmem>>, %arg5: memref<1x128xf32, #tpu.memory_space<vmem>>, %arg6: memref<128x128xbf16, #tpu.memory_space<vmem>>, %arg7: memref<1x128xf32, #tpu.memory_space<vmem>>, %arg8: memref<128x128xbf16, #tpu.memory_space<vmem>>, %arg9: memref<1x128xf32, #tpu.memory_space<vmem>>, %arg10: memref<16x128xbf16, #tpu.memory_space<vmem>>) attributes {dimension_semantics = [#tpu.dimension_semantics<parallel>], iteration_bounds = array<i64: 1>, scalar_prefetch = 0 : i64, scratch_operands = 0 : i64, tpu.core_type = #tpu.core_type<tc>, window_params = [{transform_indices = @transform_0, window_bounds = array<i64: 16, 784>}, {pipeline_mode = #tpu.pipeline_mode<synchronous>, transform_indices = @transform_1, window_bounds = array<i64: 784, 256>}, {pipeline_mode = #tpu.pipeline_mode<synchronous>, transform_indices = @transform_2, window_bounds = array<i64: 1, 256>}, {pipeline_mode = #tpu.pipeline_mode<synchronous>, transform_indices = @transform_3, window_bounds = array<i64: 256, 128>}, {pipeline_mode = #tpu.pipeline_mode<synchronous>, transform_indices = @transform_4, window_bounds = array<i64: 1, 128>}, {pipeline_mode = #tpu.pipeline_mode<synchronous>, transform_indices = @transform_5, window_bounds = array<i64: 128, 128>}, {pipeline_mode = #tpu.pipeline_mode<synchronous>, transform_indices = @transform_6, window_bounds = array<i64: 1, 128>}, {pipeline_mode = #tpu.pipeline_mode<synchronous>, transform_indices = @transform_7, window_bounds = array<i64: 128, 128>}, {pipeline_mode = #tpu.pipeline_mode<synchronous>, transform_indices = @transform_8, window_bounds = array<i64: 1, 128>}, {transform_indices = @transform_9, window_bounds = array<i64: 16, 128>}]} {
    %c0 = arith.constant 0 : index
    %c0_0 = arith.constant 0 : index
    %0 = vector.load %arg1[%c0, %c0_0] : memref<16x784xf32, #tpu.memory_space<vmem>>, vector<16x784xf32>
    %1 = arith.truncf %0 : vector<16x784xf32> to vector<16x784xbf16>
    %c0_1 = arith.constant 0 : index
    %c0_2 = arith.constant 0 : index
    %2 = vector.load %arg2[%c0_1, %c0_2] : memref<784x256xbf16, #tpu.memory_space<vmem>>, vector<784x256xbf16>
    %cst = arith.constant dense<0.000000e+00> : vector<16x256xf32>
    %3 = tpu.matmul %1, %2, %cst {dimension_numbers = #tpu.dot_dimension_numbers<[1], [0], [0], [1], [0, 0, 1, 1], [], []>} : vector<16x784xbf16>, vector<784x256xbf16>, vector<16x256xf32> -> vector<16x256xf32>
    %c0_3 = arith.constant 0 : index
    %c0_4 = arith.constant 0 : index
    %4 = vector.load %arg3[%c0_3, %c0_4] : memref<1x256xf32, #tpu.memory_space<vmem>>, vector<1x256xf32>
    %5 = vector.broadcast %4 : vector<1x256xf32> to vector<16x256xf32>
    %6 = arith.addf %3, %5 : vector<16x256xf32>
    %cst_5 = arith.constant 0.000000e+00 : f32
    %7 = vector.broadcast %cst_5 : f32 to vector<16x256xf32>
    %8 = arith.maximumf %6, %7 : vector<16x256xf32>
    %9 = arith.truncf %8 : vector<16x256xf32> to vector<16x256xbf16>
    %c0_6 = arith.constant 0 : index
    %c0_7 = arith.constant 0 : index
    %10 = vector.load %arg4[%c0_6, %c0_7] : memref<256x128xbf16, #tpu.memory_space<vmem>>, vector<256x128xbf16>
    %cst_8 = arith.constant dense<0.000000e+00> : vector<16x128xf32>
    %11 = tpu.matmul %9, %10, %cst_8 {dimension_numbers = #tpu.dot_dimension_numbers<[1], [0], [0], [1], [0, 0, 1, 1], [], []>} : vector<16x256xbf16>, vector<256x128xbf16>, vector<16x128xf32> -> vector<16x128xf32>
    %c0_9 = arith.constant 0 : index
    %c0_10 = arith.constant 0 : index
    %12 = vector.load %arg5[%c0_9, %c0_10] : memref<1x128xf32, #tpu.memory_space<vmem>>, vector<1x128xf32>
    %13 = vector.broadcast %12 : vector<1x128xf32> to vector<16x128xf32>
    %14 = arith.addf %11, %13 : vector<16x128xf32>
    %cst_11 = arith.constant 0.000000e+00 : f32
    %15 = vector.broadcast %cst_11 : f32 to vector<16x128xf32>
    %16 = arith.maximumf %14, %15 : vector<16x128xf32>
    %17 = arith.truncf %16 : vector<16x128xf32> to vector<16x128xbf16>
    %c0_12 = arith.constant 0 : index
    %c0_13 = arith.constant 0 : index
    %18 = vector.load %arg6[%c0_12, %c0_13] : memref<128x128xbf16, #tpu.memory_space<vmem>>, vector<128x128xbf16>
    %cst_14 = arith.constant dense<0.000000e+00> : vector<16x128xf32>
    %19 = tpu.matmul %17, %18, %cst_14 {dimension_numbers = #tpu.dot_dimension_numbers<[1], [0], [0], [1], [0, 0, 1, 1], [], []>} : vector<16x128xbf16>, vector<128x128xbf16>, vector<16x128xf32> -> vector<16x128xf32>
    %c0_15 = arith.constant 0 : index
    %c0_16 = arith.constant 0 : index
    %20 = vector.load %arg7[%c0_15, %c0_16] : memref<1x128xf32, #tpu.memory_space<vmem>>, vector<1x128xf32>
    %21 = vector.broadcast %20 : vector<1x128xf32> to vector<16x128xf32>
    %22 = arith.addf %19, %21 : vector<16x128xf32>
    %cst_17 = arith.constant 0.000000e+00 : f32
    %23 = vector.broadcast %cst_17 : f32 to vector<16x128xf32>
    %24 = arith.maximumf %22, %23 : vector<16x128xf32>
    %25 = arith.truncf %24 : vector<16x128xf32> to vector<16x128xbf16>
    %c0_18 = arith.constant 0 : index
    %c0_19 = arith.constant 0 : index
    %26 = vector.load %arg8[%c0_18, %c0_19] : memref<128x128xbf16, #tpu.memory_space<vmem>>, vector<128x128xbf16>
    %cst_20 = arith.constant dense<0.000000e+00> : vector<16x128xf32>
    %27 = tpu.matmul %25, %26, %cst_20 {dimension_numbers = #tpu.dot_dimension_numbers<[1], [0], [0], [1], [0, 0, 1, 1], [], []>} : vector<16x128xbf16>, vector<128x128xbf16>, vector<16x128xf32> -> vector<16x128xf32>
    %c0_21 = arith.constant 0 : index
    %c0_22 = arith.constant 0 : index
    %28 = vector.load %arg9[%c0_21, %c0_22] : memref<1x128xf32, #tpu.memory_space<vmem>>, vector<1x128xf32>
    %29 = vector.broadcast %28 : vector<1x128xf32> to vector<16x128xf32>
    %30 = arith.addf %27, %29 : vector<16x128xf32>
    %cst_23 = arith.constant dense<0xFF800000> : vector<16xf32>
    %31 = vector.multi_reduction <maximumf>, %30, %cst_23 [1] : vector<16x128xf32> to vector<16xf32>
    %32 = vector.shape_cast %31 : vector<16xf32> to vector<16x1xf32>
    %33 = vector.broadcast %32 : vector<16x1xf32> to vector<16x128xf32>
    %34 = arith.subf %30, %33 : vector<16x128xf32>
    %35 = math.exp %34 : vector<16x128xf32>
    %cst_24 = arith.constant dense<0.000000e+00> : vector<16xf32>
    %36 = vector.multi_reduction <add>, %35, %cst_24 [1] : vector<16x128xf32> to vector<16xf32>
    %37 = vector.shape_cast %36 : vector<16xf32> to vector<16x1xf32>
    %38 = math.log %37 : vector<16x1xf32>
    %39 = vector.broadcast %38 : vector<16x1xf32> to vector<16x128xf32>
    %40 = arith.subf %34, %39 : vector<16x128xf32>
    %41 = arith.truncf %40 : vector<16x128xf32> to vector<16x128xbf16>
    %c0_25 = arith.constant 0 : index
    %c0_26 = arith.constant 0 : index
    %42 = vector.load %arg10[%c0_25, %c0_26] : memref<16x128xbf16, #tpu.memory_space<vmem>>, vector<16x128xbf16>
    tpu.vector_store %arg10[%c0_25, %c0_26], %41 {strides = array<i32>} : memref<16x128xbf16, #tpu.memory_space<vmem>>, vector<16x128xbf16>,
    return
  }
  func.func @transform_0(%arg0: i32) -> (i32, i32) {
    %c0_i32 = arith.constant 0 : i32
    %c0_i32_0 = arith.constant 0 : i32
    return %arg0, %c0_i32 : i32, i32
  }
  func.func @transform_1(%arg0: i32) -> (i32, i32) {
    %c0_i32 = arith.constant 0 : i32
    %c0_i32_0 = arith.constant 0 : i32
    %c0_i32_1 = arith.constant 0 : i32
    return %c0_i32, %c0_i32_0 : i32, i32
  }
  func.func @transform_2(%arg0: i32) -> (i32, i32) {
    %c0_i32 = arith.constant 0 : i32
    %c0_i32_0 = arith.constant 0 : i32
    %c0_i32_1 = arith.constant 0 : i32
    return %c0_i32, %c0_i32_0 : i32, i32
  }
  func.func @transform_3(%arg0: i32) -> (i32, i32) {
    %c0_i32 = arith.constant 0 : i32
    %c0_i32_0 = arith.constant 0 : i32
    %c0_i32_1 = arith.constant 0 : i32
    return %c0_i32, %c0_i32_0 : i32, i32
  }
  func.func @transform_4(%arg0: i32) -> (i32, i32) {
    %c0_i32 = arith.constant 0 : i32
    %c0_i32_0 = arith.constant 0 : i32
    %c0_i32_1 = arith.constant 0 : i32
    return %c0_i32, %c0_i32_0 : i32, i32
  }
  func.func @transform_5(%arg0: i32) -> (i32, i32) {
    %c0_i32 = arith.constant 0 : i32
    %c0_i32_0 = arith.constant 0 : i32
    %c0_i32_1 = arith.constant 0 : i32
    return %c0_i32, %c0_i32_0 : i32, i32
  }
  func.func @transform_6(%arg0: i32) -> (i32, i32) {
    %c0_i32 = arith.constant 0 : i32
    %c0_i32_0 = arith.constant 0 : i32
    %c0_i32_1 = arith.constant 0 : i32
    return %c0_i32, %c0_i32_0 : i32, i32
  }
  func.func @transform_7(%arg0: i32) -> (i32, i32) {
    %c0_i32 = arith.constant 0 : i32
    %c0_i32_0 = arith.constant 0 : i32
    %c0_i32_1 = arith.constant 0 : i32
    return %c0_i32, %c0_i32_0 : i32, i32
  }
  func.func @transform_8(%arg0: i32) -> (i32, i32) {
    %c0_i32 = arith.constant 0 : i32
    %c0_i32_0 = arith.constant 0 : i32
    %c0_i32_1 = arith.constant 0 : i32
    return %c0_i32, %c0_i32_0 : i32, i32
  }
  func.func @transform_9(%arg0: i32) -> (i32, i32) {
    %c0_i32 = arith.constant 0 : i32
    %c0_i32_0 = arith.constant 0 : i32
    return %arg0, %c0_i32 : i32, i32
  }
}

</mosaic_0001>

<bundles_post_ra>
// kernel: tpu_custom_call.1
= control target key start
LH: loop header
LB: loop body
LE: loop exit
PB: predicated region body
PF: predicated region fallthrough
CT: control target
= control target key end

     0   :  { %14 = vsyncpa [#allocation3], 0  ;;  %s2317_s0 = inlined_call_operand.hbm [shape: f32[16,784], index: 0, kind: input, shape index: {}]   ;;  %s2318_s1 = inlined_call_operand.hbm [shape: bf16[784,256], index: 1, kind: input, shape index: {}]   ;;  %s2319_s2 = inlined_call_operand.hbm [shape: f32[1,256], index: 2, kind: input, shape index: {}]   ;;  %s2320_s3 = inlined_call_operand.hbm [shape: bf16[256,128], index: 3, kind: input, shape index: {}]   ;;  %s2321_s4 = inlined_call_operand.vmem [shape: f32[1,128], index: 4, kind: input, shape index: {}]   ;;  %s2322_s5 = inlined_call_operand.hbm [shape: bf16[128,128], index: 5, kind: input, shape index: {}]   ;;  %s2323_s6 = inlined_call_operand.vmem [shape: f32[1,128], index: 6, kind: input, shape index: {}]   ;;  %s2324_s7 = inlined_call_operand.hbm [shape: bf16[128,128], index: 7, kind: input, shape index: {}]   ;;  %s2325_s8 = inlined_call_operand.vmem [shape: f32[1,128], index: 8, kind: input, shape index: {}]   ;;  %s2326_s9 = inlined_call_operand.hbm [shape: bf16[16,128], index: 9, kind: output, shape index: {}]  }
   0x1   :  { %15 = vsyncpa [#allocation6], 0 }
   0x2   :  { %16 = vsyncpa [#allocation9], 0 }
   0x3   :  { %17 = vsyncpa [#allocation12], 0  ;;  %s36_s11 = sshll.u32 %s2318_s1, 4  ;;  %s37_s11 = int_to_ptr.hbm [resolvable:$true] %s36_s11 }
   0x4   :  { %18 = vsyncpa [#allocation4], 0  ;;  %s2182_s12 = smov [#allocation5]   ;;  %s60_s16 = sshll.u32 %s2320_s3, 4  ;;  %s61_s16 = int_to_ptr.hbm [resolvable:$true] %s60_s16 }
   0x5   :  { %s38_s13 = sshll.u32 %s2182_s12, 4  ;;  %s2183_s17 = smov 128   ;;  %s39_s13 = int_to_ptr.vmem [resolvable:$true] %s38_s13 }
   0x6   :  { %s2184_s18 = smov 8   ;;  %s2185_s19 = smov [#allocation8]  }
   0x7   :  { %44 = dma.hbm_to_vmem [thread:$0]  %s37_s11, 12544, %s39_s13, [#allocation6], %s2183_s17, %s2183_s17, %s2184_s18  }
   0x8   :  { %s62_s20 = sshll.u32 %s2185_s19, 4  ;;  %s2186_s21 = smov 64   ;;  %s63_s20 = int_to_ptr.vmem [resolvable:$true] %s62_s20 }
   0x9   :  { %s2187_s22 = smov 4   ;;  %s23_s24 = sshll.u32 %s2317_s0, 4  ;;  %s24_s24 = int_to_ptr.hbm [resolvable:$true] %s23_s24 }
   0xa   :  { %68 = dma.hbm_to_vmem [thread:$0]  %s61_s16, 2048, %s63_s20, [#allocation9], %s2186_s21, %s2186_s21, %s2187_s22  }
   0xb   :  { %s2188_s25 = smov [#allocation2]   ;;  %s50_s28 = sshll.u32 %s2319_s2, 4  ;;  %s51_s28 = int_to_ptr.hbm [resolvable:$true] %s50_s28 }
   0xc   :  { %s25_s3 = sshll.u32 %s2188_s25, 4  ;;  %s2189_s29 = smov 896   ;;  %s26_s3 = int_to_ptr.vmem [resolvable:$true] %s25_s3 }
   0xd   :  { %s2190_s30 = smov 56   ;;  %s2191_s10 = smov [#allocation7]  }
   0xe   :  { %31 = dma.hbm_to_vmem [thread:$0]  %s24_s24, 1792, %s26_s3, [#allocation3], %s2189_s29, %s2189_s29, %s2190_s30  }
   0xf   :  { %s52_s11 = sshll.u32 %s2191_s10, 4  ;;  %s75_s14 = sshll.u32 %s2322_s5, 4  ;;  %s53_s11 = int_to_ptr.vmem [resolvable:$true] %s52_s11  ;;  %s76_s14 = int_to_ptr.hbm [resolvable:$true] %s75_s14 }
  0x10   :  { %55 = dma.hbm_to_vmem [thread:$0]  %s51_s28, 32, %s53_s11, [#allocation6]  }
  0x11   :  { %s90_s16 = sshll.u32 %s2324_s7, 4  ;;  %s2192_s17 = smov [#allocation10]   ;;  %s91_s16 = int_to_ptr.hbm [resolvable:$true] %s90_s16 }
  0x12   :  { %s77_s18 = sshll.u32 %s2192_s17, 4  ;;  %s2193_s2 = smov [#allocation11]   ;;  %s78_s18 = int_to_ptr.vmem [resolvable:$true] %s77_s18 }
  0x13   :  { %83 = dma.hbm_to_vmem [thread:$0]  %s76_s14, 1024, %s78_s18, [#allocation9], %s2186_s21, %s2186_s21, %s2187_s22  }
  0x14   :  { %s92_s19 = sshll.u32 %s2193_s2, 4  ;;  %s93_s19 = int_to_ptr.vmem [resolvable:$true] %s92_s19 }
  0x15   :  { %98 = dma.hbm_to_vmem [thread:$0]  %s91_s16, 1024, %s93_s19, [#allocation12], %s2186_s21, %s2186_s21, %s2187_s22  }
  0x16   :  { %2172 = dma.done.wait [#allocation3], 1792  }
  0x17   :  { %2173 = vsyncadd [#allocation3], 4294965504 }
  0x18   :  { %2174 = dma.done.wait [#allocation6], 12576  }
  0x19   :  { %2175 = vsyncadd [#allocation6], 4294954720 }
  0x1a   :  { %2176 = dma.done.wait [#allocation9], 3072  }
  0x1b   :  { %2177 = vsyncadd [#allocation9], 4294964224 }
  0x1c   :  { %2178 = dma.done.wait [#allocation12], 1024  }
  0x1d   :  { %2179 = vsyncadd [#allocation12], 4294966272  ;;  %v1381_v0 = vld [vmem:[#allocation5 + $0x70] sm:$0xf]  ;;  %v1860_v1 = vld [vmem:[#allocation5 + $0x74] sm:$0xf0] }
  0x1e   :  { %v1509_v2 = vld [vmem:[#allocation5 + $0x170] sm:$0xf]  ;;  %v1382_v3 = vor.u32 %v1860_v1, %v1381_v0  ;;  %v1892_v4 = vld [vmem:[#allocation5 + $0x174] sm:$0xf0]  ;;  %v1373_v11 = vld [vmem:[#allocation5 + $0x60] sm:$0xf] }
  0x1f   :  { %v1573_v5 = vld [vmem:[#allocation5 + $0x1f0] sm:$0xf]  ;;  %v1908_v6 = vld [vmem:[#allocation5 + $0x1f4] sm:$0xf0]  ;;  %v1510_v7 = vor.u32 %v1892_v4, %v1509_v2  ;;  %v1858_v13 = vld [vmem:[#allocation5 + $0x64] sm:$0xf0] }
  0x20   :  { %v1574_v8 = vor.u32 %v1908_v6, %v1573_v5  ;;  %v1445_v9 = vld [vmem:[#allocation5 + $0xf0] sm:$0xf]  ;;  %v1876_v10 = vld [vmem:[#allocation5 + $0xf4] sm:$0xf0]  ;;  %745 = vmatpush.bf16.msra.mxu0 %v1382_v3  ;;  %v1501_v14 = vld [vmem:[#allocation5 + $0x160] sm:$0xf]  ;;  %v1374_v16 = vor.u32 %v1858_v13, %v1373_v11 }
  0x21   :  { %v1446_v12 = vor.u32 %v1876_v10, %v1445_v9  ;;  %v1890_v15 = vld [vmem:[#allocation5 + $0x164] sm:$0xf0]  ;;  %773 = vmatpush.bf16.msra.mxu2 %v1510_v7  ;;  %v1565_v18 = vld [vmem:[#allocation5 + $0x1e0] sm:$0xf]  ;;  %v1365_v23 = vld [vmem:[#allocation5 + $0x50] sm:$0xf] }
  0x22   :  { %787 = vmatpush.bf16.msra.mxu3 %v1574_v8  ;;  %v1502_v17 = vor.u32 %v1890_v15, %v1501_v14  ;;  %v1906_v19 = vld [vmem:[#allocation5 + $0x1e4] sm:$0xf0]  ;;  %v1437_v20 = vld [vmem:[#allocation5 + $0xe0] sm:$0xf]  ;;  %v1856_v24 = vld [vmem:[#allocation5 + $0x54] sm:$0xf0] }
  0x23   :  { %759 = vmatpush.bf16.msra.mxu1 %v1446_v12  ;;  %v1566_v21 = vor.u32 %v1906_v19, %v1565_v18  ;;  %v1874_v22 = vld [vmem:[#allocation5 + $0xe4] sm:$0xf0]  ;;  %v1493_v26 = vld [vmem:[#allocation5 + $0x150] sm:$0xf]  ;;  %v1888_v27 = vld [vmem:[#allocation5 + $0x154] sm:$0xf0]  ;;  %v1366_v29 = vor.u32 %v1856_v24, %v1365_v23 }
  0x24   :  { %v1438_v25 = vor.u32 %v1874_v22, %v1437_v20  ;;  %v1557_v28 = vld [vmem:[#allocation5 + $0x1d0] sm:$0xf]  ;;  %746 = vmatpush.bf16.msra.mxu0 %v1374_v16  ;;  %v1904_v30 = vld [vmem:[#allocation5 + $0x1d4] sm:$0xf0]  ;;  %v1494_v33 = vor.u32 %v1888_v27, %v1493_v26  ;;  %v1357_v35 = vld [vmem:[#allocation5 + $0x40] sm:$0xf] }
  0x25   :  { %v1429_v31 = vld [vmem:[#allocation5 + $0xd0] sm:$0xf]  ;;  %v1872_v32 = vld [vmem:[#allocation5 + $0xd4] sm:$0xf0]  ;;  %774 = vmatpush.bf16.msra.mxu2 %v1502_v17  ;;  %v1558_v34 = vor.u32 %v1904_v30, %v1557_v28  ;;  %v1854_v36 = vld [vmem:[#allocation5 + $0x44] sm:$0xf0] }
  0x26   :  { %788 = vmatpush.bf16.msra.mxu3 %v1566_v21  ;;  %v1485_v37 = vld [vmem:[#allocation5 + $0x140] sm:$0xf]  ;;  %v1430_v38 = vor.u32 %v1872_v32, %v1429_v31  ;;  %v1886_v39 = vld [vmem:[#allocation5 + $0x144] sm:$0xf0]  ;;  %v1358_v44 = vor.u32 %v1854_v36, %v1357_v35  ;;  %v1349_v47 = vld [vmem:[#allocation5 + $0x30] sm:$0xf] }
  0x27   :  { %760 = vmatpush.bf16.msra.mxu1 %v1438_v25  ;;  %v1549_v40 = vld [vmem:[#allocation5 + $0x1c0] sm:$0xf]  ;;  %v1902_v41 = vld [vmem:[#allocation5 + $0x1c4] sm:$0xf0]  ;;  %v1486_v45 = vor.u32 %v1886_v39, %v1485_v37  ;;  %v1852_v48 = vld [vmem:[#allocation5 + $0x34] sm:$0xf0] }
  0x28   :  { %v1421_v42 = vld [vmem:[#allocation5 + $0xc0] sm:$0xf]  ;;  %v1870_v43 = vld [vmem:[#allocation5 + $0xc4] sm:$0xf0]  ;;  %747 = vmatpush.bf16.msra.mxu0 %v1366_v29  ;;  %v1550_v46 = vor.u32 %v1902_v41, %v1549_v40  ;;  %v1477_v49 = vld [vmem:[#allocation5 + $0x130] sm:$0xf]  ;;  %v1350_v56 = vor.u32 %v1852_v48, %v1349_v47 }
  0x29   :  { %775 = vmatpush.bf16.msra.mxu2 %v1494_v33  ;;  %v1422_v50 = vor.u32 %v1870_v43, %v1421_v42  ;;  %v1884_v51 = vld [vmem:[#allocation5 + $0x134] sm:$0xf0]  ;;  %v1541_v52 = vld [vmem:[#allocation5 + $0x1b0] sm:$0xf]  ;;  %v1341_v59 = vld [vmem:[#allocation5 + $0x20] sm:$0xf] }
  0x2a   :  { %789 = vmatpush.bf16.msra.mxu3 %v1558_v34  ;;  %v1900_v53 = vld [vmem:[#allocation5 + $0x1b4] sm:$0xf0]  ;;  %v1413_v54 = vld [vmem:[#allocation5 + $0xb0] sm:$0xf]  ;;  %v1478_v57 = vor.u32 %v1884_v51, %v1477_v49  ;;  %v1850_v60 = vld [vmem:[#allocation5 + $0x24] sm:$0xf0] }
  0x2b   :  { %761 = vmatpush.bf16.msra.mxu1 %v1430_v38  ;;  %v1868_v55 = vld [vmem:[#allocation5 + $0xb4] sm:$0xf0]  ;;  %v1542_v58 = vor.u32 %v1900_v53, %v1541_v52  ;;  %v1469_v61 = vld [vmem:[#allocation5 + $0x120] sm:$0xf]  ;;  %v1882_v63 = vld [vmem:[#allocation5 + $0x124] sm:$0xf0]  ;;  %v1342_v4 = vor.u32 %v1850_v60, %v1341_v59 }
  0x2c   :  { %748 = vmatpush.bf16.msra.mxu0 %v1358_v44  ;;  %v1414_v62 = vor.u32 %v1868_v55, %v1413_v54  ;;  %v1533_v0 = vld [vmem:[#allocation5 + $0x1a0] sm:$0xf]  ;;  %v1898_v1 = vld [vmem:[#allocation5 + $0x1a4] sm:$0xf0]  ;;  %v1333_v5 = vld [vmem:[#allocation5 + $0x10] sm:$0xf]  ;;  %v1470_v6 = vor.u32 %v1882_v63, %v1469_v61 }
  0x2d   :  { %776 = vmatpush.bf16.msra.mxu2 %v1486_v45  ;;  %v1405_v2 = vld [vmem:[#allocation5 + $0xa0] sm:$0xf]  ;;  %v1866_v3 = vld [vmem:[#allocation5 + $0xa4] sm:$0xf0]  ;;  %v1534_v7 = vor.u32 %v1898_v1, %v1533_v0  ;;  %v1848_v8 = vld [vmem:[#allocation5 + $0x14] sm:$0xf0] }
  0x2e   :  { %790 = vmatpush.bf16.msra.mxu3 %v1550_v46  ;;  %v1461_v9 = vld [vmem:[#allocation5 + $0x110] sm:$0xf]  ;;  %v1880_v10 = vld [vmem:[#allocation5 + $0x114] sm:$0xf0]  ;;  %v1406_v11 = vor.u32 %v1866_v3, %v1405_v2  ;;  %v1325_v16 = vld [vmem:[#allocation5] sm:$0xf]  ;;  %v1334_v18 = vor.u32 %v1848_v8, %v1333_v5 }
  0x2f   :  { %762 = vmatpush.bf16.msra.mxu1 %v1422_v50  ;;  %v1525_v12 = vld [vmem:[#allocation5 + $0x190] sm:$0xf]  ;;  %v1896_v13 = vld [vmem:[#allocation5 + $0x194] sm:$0xf0]  ;;  %v1846_v17 = vld [vmem:[#allocation5 + $0x4] sm:$0xf0]  ;;  %v1462_v23 = vor.u32 %v1880_v10, %v1461_v9 }
  0x30   :  { %749 = vmatpush.bf16.msra.mxu0 %v1350_v56  ;;  %v1397_v14 = vld [vmem:[#allocation5 + $0x90] sm:$0xf]  ;;  %v1864_v15 = vld [vmem:[#allocation5 + $0x94] sm:$0xf0]  ;;  %v1453_v19 = vld [vmem:[#allocation5 + $0x100] sm:$0xf]  ;;  %v1526_v24 = vor.u32 %v1896_v13, %v1525_v12  ;;  %v1326_v35 = vor.u32 %v1846_v17, %v1325_v16 }
  0x31   :  { %777 = vmatpush.bf16.msra.mxu2 %v1478_v57  ;;  %v1878_v20 = vld [vmem:[#allocation5 + $0x104] sm:$0xf0]  ;;  %v1517_v21 = vld [vmem:[#allocation5 + $0x180] sm:$0xf]  ;;  %v1637_v25 = vld [vmem:[#allocation5 + $0x270] sm:$0xf]  ;;  %v1398_v28 = vor.u32 %v1864_v15, %v1397_v14 }
  0x32   :  { %791 = vmatpush.bf16.msra.mxu3 %v1542_v58  ;;  %v1894_v22 = vld [vmem:[#allocation5 + $0x184] sm:$0xf0]  ;;  %v1924_v26 = vld [vmem:[#allocation5 + $0x274] sm:$0xf0]  ;;  %v1859_v27 = vld [vmem:[#allocation5 + $0x74] sm:$0xf]  ;;  %v1454_v39 = vor.u32 %v1878_v20, %v1453_v19 }
  0x33   :  { %763 = vmatpush.bf16.msra.mxu1 %v1414_v62  ;;  %v1383_v29 = vld [vmem:[#allocation5 + $0x78] sm:$0xf0]  ;;  %v1389_v30 = vld [vmem:[#allocation5 + $0x80] sm:$0xf]  ;;  %v1862_v31 = vld [vmem:[#allocation5 + $0x84] sm:$0xf0]  ;;  %v1518_v40 = vor.u32 %v1894_v22, %v1517_v21  ;;  %v1638_v44 = vor.u32 %v1924_v26, %v1637_v25 }
  0x34   :  { %750 = vmatpush.bf16.msra.mxu0 %v1342_v4  ;;  %v128_v32 = vld [vmem:[#allocation2 + $0x10] sm:$0xff]  ;;  %v135_v33 = vld [vmem:[#allocation2 + $0x48] sm:$0xff]  ;;  %v1701_v34 = vld [vmem:[#allocation5 + $0x2f0] sm:$0xf]  ;;  %v1386_v45 = vor.u32 %v1859_v27, %v1383_v29  ;;  %v1390_v49 = vor.u32 %v1862_v31, %v1389_v30  ;;  %vm741_vm0 = vcmask 130048   ;;  %s1307_s3 = sshll.u32 %s2326_s9, 4  ;;  %s1308_s3 = int_to_ptr.hbm [resolvable:$true] %s1307_s3 }
  0x35   :  { %778 = vmatpush.bf16.msra.mxu2 %v1470_v6  ;;  %v1940_v36 = vld [vmem:[#allocation5 + $0x2f4] sm:$0xf0]  ;;  %v1709_v37 = vld [vmem:[#allocation5 + $0x300] sm:$0xf]  ;;  %v1942_v38 = vld [vmem:[#allocation5 + $0x304] sm:$0xf0]  ;;  %v2272_v54 = vpack.c.bf16 %v135_v33, %v128_v32 }
  0x36   :  { %792 = vmatpush.bf16.msra.mxu3 %v1534_v7  ;;  %v1875_v41 = vld [vmem:[#allocation5 + $0xf4] sm:$0xf]  ;;  %v1447_v42 = vld [vmem:[#allocation5 + $0xf8] sm:$0xf0]  ;;  %v133_v46 = vld [vmem:[#allocation2 + $0x38] sm:$0xff]  ;;  %v1710_v50 = vor.u32 %v1942_v38, %v1709_v37  ;;  %v1702_v55 = vor.u32 %v1940_v36, %v1701_v34 }
  0x37   :  { %764 = vmatpush.bf16.msra.mxu1 %v1406_v11  ;;  %v126_v43 = vld [vmem:[#allocation2] sm:$0xff]  ;;  %v129_v47 = vld [vmem:[#allocation2 + $0x18] sm:$0xff]  ;;  %v136_v48 = vld [vmem:[#allocation2 + $0x50] sm:$0xff]  ;;  %v1450_v59 = vor.u32 %v1875_v41, %v1447_v42 }
  0x38   :  { %751 = vmatpush.bf16.msra.mxu0 %v1334_v18  ;;  %v1629_v51 = vld [vmem:[#allocation5 + $0x260] sm:$0xf]  ;;  %v1922_v52 = vld [vmem:[#allocation5 + $0x264] sm:$0xf0]  ;;  %v1857_v53 = vld [vmem:[#allocation5 + $0x64] sm:$0xf]  ;;  %v2274_v60 = vpack.c.bf16 %v133_v46, %v126_v43  ;;  %v2276_v63 = vpack.c.bf16 %v136_v48, %v129_v47 }
  0x39   :  { %779 = vmatpush.bf16.msra.mxu2 %v1462_v23  ;;  %v1375_v56 = vld [vmem:[#allocation5 + $0x68] sm:$0xf0]  ;;  %v127_v57 = vld [vmem:[#allocation2 + $0x8] sm:$0xff]  ;;  %v134_v58 = vld [vmem:[#allocation2 + $0x40] sm:$0xff]  ;;  %v1630_v0 = vor.u32 %v1922_v52, %v1629_v51 }
  0x3a   :  { %793 = vmatpush.bf16.msra.mxu3 %v1526_v24  ;;  %v1693_v61 = vld [vmem:[#allocation5 + $0x2e0] sm:$0xf]  ;;  %v1938_v62 = vld [vmem:[#allocation5 + $0x2e4] sm:$0xf0]  ;;  %v1873_v1 = vld [vmem:[#allocation5 + $0xe4] sm:$0xf]  ;;  %v1378_v3 = vor.u32 %v1857_v53, %v1375_v56  ;;  %v2278_v4 = vpack.c.bf16 %v134_v58, %v127_v57 }
  0x3b   :  { %765 = vmatpush.bf16.msra.mxu1 %v1398_v28  ;;  %v1439_v2 = vld [vmem:[#allocation5 + $0xe8] sm:$0xf0]  ;;  %v1621_v5 = vld [vmem:[#allocation5 + $0x250] sm:$0xf]  ;;  %v1920_v6 = vld [vmem:[#allocation5 + $0x254] sm:$0xf0]  ;;  %v1694_v7 = vor.u32 %v1938_v62, %v1693_v61 }
  0x3c   :  { %752 = vmatpush.bf16.msra.mxu0 %v1326_v35  ;;  %v1855_v8 = vld [vmem:[#allocation5 + $0x54] sm:$0xf]  ;;  %v1367_v9 = vld [vmem:[#allocation5 + $0x58] sm:$0xf0]  ;;  %v1442_v10 = vor.u32 %v1873_v1, %v1439_v2  ;;  %v1685_v11 = vld [vmem:[#allocation5 + $0x2d0] sm:$0xf]  ;;  %v1622_v13 = vor.u32 %v1920_v6, %v1621_v5 }
  0x3d   :  { %780 = vmatpush.bf16.msra.mxu2 %v1454_v39  ;;  %v1936_v12 = vld [vmem:[#allocation5 + $0x2d4] sm:$0xf0]  ;;  %v1871_v14 = vld [vmem:[#allocation5 + $0xd4] sm:$0xf]  ;;  %v1431_v15 = vld [vmem:[#allocation5 + $0xd8] sm:$0xf0]  ;;  %v1370_v16 = vor.u32 %v1855_v8, %v1367_v9 }
  0x3e   :  { %794 = vmatpush.bf16.msra.mxu3 %v1518_v40  ;;  %v1613_v17 = vld [vmem:[#allocation5 + $0x240] sm:$0xf]  ;;  %v1918_v18 = vld [vmem:[#allocation5 + $0x244] sm:$0xf0]  ;;  %v1686_v19 = vor.u32 %v1936_v12, %v1685_v11  ;;  %v1853_v20 = vld [vmem:[#allocation5 + $0x44] sm:$0xf]  ;;  %v1434_v22 = vor.u32 %v1871_v14, %v1431_v15 }
  0x3f   :  { %766 = vmatpush.bf16.msra.mxu1 %v1390_v49  ;;  %753 = vmatmul.bf16.vlgmr.msra.gmra.mxu0 %v2274_v60  ;;  %v1359_v21 = vld [vmem:[#allocation5 + $0x48] sm:$0xf0]  ;;  %v1677_v23 = vld [vmem:[#allocation5 + $0x2c0] sm:$0xf]  ;;  %v1934_v24 = vld [vmem:[#allocation5 + $0x2c4] sm:$0xf0]  ;;  %v1614_v25 = vor.u32 %v1918_v18, %v1613_v17 }
  0x40   :  { %801 = vmatpush.bf16.msrb.mxu0 %v1638_v44  ;;  %781 = vmatmul.bf16.vlgmr.msra.gmra.mxu2 %v2272_v54  ;;  %v1869_v26 = vld [vmem:[#allocation5 + $0xc4] sm:$0xf]  ;;  %v1423_v27 = vld [vmem:[#allocation5 + $0xc8] sm:$0xf0]  ;;  %v1362_v28 = vor.u32 %v1853_v20, %v1359_v21  ;;  %v1605_v29 = vld [vmem:[#allocation5 + $0x230] sm:$0xf]  ;;  %v1678_v31 = vor.u32 %v1934_v24, %v1677_v23 }
  0x41   :  { %836 = vmatpush.bf16.msrb.mxu2 %v1710_v50  ;;  %795 = vmatmul.bf16.vlgmr.msra.gmra.mxu3 %v2276_v63  ;;  %v1916_v30 = vld [vmem:[#allocation5 + $0x234] sm:$0xf0]  ;;  %v1851_v32 = vld [vmem:[#allocation5 + $0x34] sm:$0xf]  ;;  %v1351_v33 = vld [vmem:[#allocation5 + $0x38] sm:$0xf0]  ;;  %v1426_v35 = vor.u32 %v1869_v26, %v1423_v27 }
  0x42   :  { %843 = vmatpush.bf16.msrb.mxu3 %v1386_v45  ;;  %767 = vmatmul.bf16.vlgmr.msra.gmra.mxu1 %v2278_v4  ;;  %v1669_v34 = vld [vmem:[#allocation5 + $0x2b0] sm:$0xf]  ;;  %v1932_v36 = vld [vmem:[#allocation5 + $0x2b4] sm:$0xf0]  ;;  %v132_v37 = vld [vmem:[#allocation2 + $0x30] sm:$0xff]  ;;  %v1606_v39 = vor.u32 %v1916_v30, %v1605_v29  ;;  %v1354_v42 = vor.u32 %v1851_v32, %v1351_v33 }
  0x43   :  { %815 = vmatpush.bf16.msrb.mxu1 %v1702_v55  ;;  %v139_v38 = vld [vmem:[#allocation2 + $0x68] sm:$0xff]  ;;  %v1867_v40 = vld [vmem:[#allocation5 + $0xb4] sm:$0xf]  ;;  %v1597_v43 = vld [vmem:[#allocation5 + $0x220] sm:$0xf]  ;;  %v1670_v45 = vor.u32 %v1932_v36, %v1669_v34 }
  0x44   :  { %802 = vmatpush.bf16.msrb.mxu0 %v1630_v0  ;;  %v1415_v41 = vld [vmem:[#allocation5 + $0xb8] sm:$0xf0]  ;;  %v1914_v44 = vld [vmem:[#allocation5 + $0x224] sm:$0xf0]  ;;  %v1849_v46 = vld [vmem:[#allocation5 + $0x24] sm:$0xf]  ;;  %v2284_v48 = vpack.c.bf16 %v139_v38, %v132_v37 }
  0x45   :  { %857 = vmatpush.bf16.msra.mxu2 %v1450_v59  ;;  %v1343_v47 = vld [vmem:[#allocation5 + $0x28] sm:$0xf0]  ;;  %v1418_v49 = vor.u32 %v1867_v40, %v1415_v41  ;;  %v1661_v50 = vld [vmem:[#allocation5 + $0x2a0] sm:$0xf]  ;;  %v1930_v51 = vld [vmem:[#allocation5 + $0x2a4] sm:$0xf0]  ;;  %v1598_v52 = vor.u32 %v1914_v44, %v1597_v43 }
  0x46   :  { %844 = vmatpush.bf16.msrb.mxu3 %v1378_v3  ;;  %v1865_v53 = vld [vmem:[#allocation5 + $0xa4] sm:$0xf]  ;;  %v1407_v55 = vld [vmem:[#allocation5 + $0xa8] sm:$0xf0]  ;;  %v1346_v56 = vor.u32 %v1849_v46, %v1343_v47  ;;  %v1589_v57 = vld [vmem:[#allocation5 + $0x210] sm:$0xf]  ;;  %v1662_v61 = vor.u32 %v1930_v51, %v1661_v50 }
  0x47   :  { %816 = vmatpush.bf16.msrb.mxu1 %v1694_v7  ;;  %v1912_v58 = vld [vmem:[#allocation5 + $0x214] sm:$0xf0]  ;;  %v1847_v59 = vld [vmem:[#allocation5 + $0x14] sm:$0xf]  ;;  %v1335_v62 = vld [vmem:[#allocation5 + $0x18] sm:$0xf0]  ;;  %v1410_v2 = vor.u32 %v1865_v53, %v1407_v55 }
  0x48   :  { %803 = vmatpush.bf16.msrb.mxu0 %v1622_v13  ;;  %v1653_v0 = vld [vmem:[#allocation5 + $0x290] sm:$0xf]  ;;  %v1928_v1 = vld [vmem:[#allocation5 + $0x294] sm:$0xf0]  ;;  %v1863_v3 = vld [vmem:[#allocation5 + $0x94] sm:$0xf]  ;;  %v1590_v7 = vor.u32 %v1912_v58, %v1589_v57  ;;  %v1338_v11 = vor.u32 %v1847_v59, %v1335_v62 }
  0x49   :  { %858 = vmatpush.bf16.msra.mxu2 %v1442_v10  ;;  %v1399_v5 = vld [vmem:[#allocation5 + $0x98] sm:$0xf0]  ;;  %v1581_v6 = vld [vmem:[#allocation5 + $0x200] sm:$0xf]  ;;  %v1910_v8 = vld [vmem:[#allocation5 + $0x204] sm:$0xf0]  ;;  %v1654_v15 = vor.u32 %v1928_v1, %v1653_v0 }
  0x4a   :  { %845 = vmatpush.bf16.msrb.mxu3 %v1370_v16  ;;  %v1845_v9 = vld [vmem:[#allocation5 + $0x4] sm:$0xf]  ;;  %v1327_v10 = vld [vmem:[#allocation5 + $0x8] sm:$0xf0]  ;;  %v1891_v12 = vld [vmem:[#allocation5 + $0x174] sm:$0xf]  ;;  %v1582_v23 = vor.u32 %v1910_v8, %v1581_v6 }
  0x4b   :  { %817 = vmatpush.bf16.msrb.mxu1 %v1686_v19  ;;  %v1511_v13 = vld [vmem:[#allocation5 + $0x178] sm:$0xf0]  ;;  %v1923_v14 = vld [vmem:[#allocation5 + $0x274] sm:$0xf]  ;;  %v1645_v17 = vld [vmem:[#allocation5 + $0x280] sm:$0xf]  ;;  %v1402_v19 = vor.u32 %v1863_v3, %v1399_v5  ;;  %v1330_v27 = vor.u32 %v1845_v9, %v1327_v10 }
  0x4c   :  { %804 = vmatpush.bf16.msrb.mxu0 %v1614_v25  ;;  %v1639_v16 = vld [vmem:[#allocation5 + $0x278] sm:$0xf0]  ;;  %v1926_v18 = vld [vmem:[#allocation5 + $0x284] sm:$0xf0]  ;;  %v130_v20 = vld [vmem:[#allocation2 + $0x20] sm:$0xff] }
  0x4d   :  { %859 = vmatpush.bf16.msra.mxu2 %v1434_v22  ;;  %v137_v21 = vld [vmem:[#allocation2 + $0x58] sm:$0xff]  ;;  %v1861_v22 = vld [vmem:[#allocation5 + $0x84] sm:$0xf]  ;;  %v1907_v25 = vld [vmem:[#allocation5 + $0x1f4] sm:$0xf]  ;;  %v1642_v32 = vor.u32 %v1923_v14, %v1639_v16  ;;  %v1646_v33 = vor.u32 %v1926_v18, %v1645_v17 }
  0x4e   :  { %846 = vmatpush.bf16.msrb.mxu3 %v1362_v28  ;;  %v1391_v24 = vld [vmem:[#allocation5 + $0x88] sm:$0xf0]  ;;  %v1575_v26 = vld [vmem:[#allocation5 + $0x1f8] sm:$0xf0]  ;;  %v1514_v28 = vor.u32 %v1891_v12, %v1511_v13  ;;  %v1939_v29 = vld [vmem:[#allocation5 + $0x2f4] sm:$0xf]  ;;  %v2288_v37 = vpack.c.bf16 %v137_v21, %v130_v20 }
  0x4f   :  { %818 = vmatpush.bf16.msrb.mxu1 %v1678_v31  ;;  %v1703_v30 = vld [vmem:[#allocation5 + $0x2f8] sm:$0xf0]  ;;  %v138_v34 = vld [vmem:[#allocation2 + $0x60] sm:$0xff]  ;;  %v1503_v36 = vld [vmem:[#allocation5 + $0x168] sm:$0xf0]  ;;  %v1394_v38 = vor.u32 %v1861_v22, %v1391_v24  ;;  %v1578_v41 = vor.u32 %v1907_v25, %v1575_v26 }
  0x50   :  { %805 = vmatpush.bf16.msrb.mxu0 %v1606_v39  ;;  %1715 = vmatmul.msk.bf16.vlgmr.msrb.gmra.mxu2 %vm741_vm0, %v2284_v48  ;;  %v131_v31 = vld [vmem:[#allocation2 + $0x28] sm:$0xff]  ;;  %v1921_v39 = vld [vmem:[#allocation5 + $0x264] sm:$0xf]  ;;  %v1631_v40 = vld [vmem:[#allocation5 + $0x268] sm:$0xf0] }
  0x51   :  { %860 = vmatpush.bf16.msra.mxu2 %v1426_v35  ;;  %v1889_v35 = vld [vmem:[#allocation5 + $0x164] sm:$0xf]  ;;  %v2290_v44 = vpack.c.bf16 %v138_v34, %v131_v31  ;;  %v1567_v46 = vld [vmem:[#allocation5 + $0x1e8] sm:$0xf0]  ;;  %v1634_v50 = vor.u32 %v1921_v39, %v1631_v40  ;;  %v1887_v51 = vld [vmem:[#allocation5 + $0x154] sm:$0xf] }
  0x52   :  { %847 = vmatpush.bf16.msrb.mxu3 %v1354_v42  ;;  %v1706_v42 = vor.u32 %v1939_v29, %v1703_v30  ;;  %v1905_v43 = vld [vmem:[#allocation5 + $0x1e4] sm:$0xf]  ;;  %v1919_v53 = vld [vmem:[#allocation5 + $0x254] sm:$0xf]  ;;  %v1623_v55 = vld [vmem:[#allocation5 + $0x258] sm:$0xf0] }
  0x53   :  { %819 = vmatpush.bf16.msrb.mxu1 %v1670_v45  ;;  %v1506_v45 = vor.u32 %v1889_v35, %v1503_v36  ;;  %v1937_v47 = vld [vmem:[#allocation5 + $0x2e4] sm:$0xf]  ;;  %v1903_v58 = vld [vmem:[#allocation5 + $0x1d4] sm:$0xf]  ;;  %v1687_v0 = vld [vmem:[#allocation5 + $0x2d8] sm:$0xf0]  ;;  %v1626_v1 = vor.u32 %v1919_v53, %v1623_v55 }
  0x54   :  { %806 = vmatpush.bf16.msrb.mxu0 %v1598_v52  ;;  %v1495_v52 = vld [vmem:[#allocation5 + $0x158] sm:$0xf0]  ;;  %v1935_v62 = vld [vmem:[#allocation5 + $0x2d4] sm:$0xf]  ;;  %v1487_v3 = vld [vmem:[#allocation5 + $0x148] sm:$0xf0] }
  0x55   :  { %861 = vmatpush.bf16.msra.mxu2 %v1418_v49  ;;  %v1695_v49 = vld [vmem:[#allocation5 + $0x2e8] sm:$0xf0]  ;;  %v1498_v59 = vor.u32 %v1887_v51, %v1495_v52  ;;  %v1917_v5 = vld [vmem:[#allocation5 + $0x244] sm:$0xf]  ;;  %v1690_v9 = vor.u32 %v1935_v62, %v1687_v0  ;;  %v1479_v16 = vld [vmem:[#allocation5 + $0x138] sm:$0xf0] }
  0x56   :  { %848 = vmatpush.bf16.msrb.mxu3 %v1346_v56  ;;  %v1570_v56 = vor.u32 %v1905_v43, %v1567_v46  ;;  %v1698_v57 = vor.u32 %v1937_v47, %v1695_v49  ;;  %v1615_v6 = vld [vmem:[#allocation5 + $0x248] sm:$0xf0]  ;;  %v1915_v17 = vld [vmem:[#allocation5 + $0x234] sm:$0xf]  ;;  %v1543_v21 = vld [vmem:[#allocation5 + $0x1b8] sm:$0xf0] }
  0x57   :  { %820 = vmatpush.bf16.msrb.mxu1 %v1662_v61  ;;  %v1559_v61 = vld [vmem:[#allocation5 + $0x1d8] sm:$0xf0]  ;;  %v1551_v10 = vld [vmem:[#allocation5 + $0x1c8] sm:$0xf0]  ;;  %v1618_v14 = vor.u32 %v1917_v5, %v1615_v6  ;;  %v1931_v22 = vld [vmem:[#allocation5 + $0x2b4] sm:$0xf] }
  0x58   :  { %807 = vmatpush.bf16.msrb.mxu0 %v1590_v7  ;;  %v1901_v7 = vld [vmem:[#allocation5 + $0x1c4] sm:$0xf]  ;;  %v1562_v8 = vor.u32 %v1903_v58, %v1559_v61  ;;  %v1679_v12 = vld [vmem:[#allocation5 + $0x2c8] sm:$0xf0]  ;;  %v1463_v39 = vld [vmem:[#allocation5 + $0x118] sm:$0xf0] }
  0x59   :  { %862 = vmatpush.bf16.msra.mxu2 %v1410_v2  ;;  %v1885_v2 = vld [vmem:[#allocation5 + $0x144] sm:$0xf]  ;;  %v1554_v18 = vor.u32 %v1901_v7, %v1551_v10  ;;  %v1471_v26 = vld [vmem:[#allocation5 + $0x128] sm:$0xf0]  ;;  %v1911_v40 = vld [vmem:[#allocation5 + $0x214] sm:$0xf] }
  0x5a   :  { %849 = vmatpush.bf16.msrb.mxu3 %v1338_v11  ;;  %v1933_v11 = vld [vmem:[#allocation5 + $0x2c4] sm:$0xf]  ;;  %v1490_v13 = vor.u32 %v1885_v2, %v1487_v3  ;;  %v1663_v35 = vld [vmem:[#allocation5 + $0x2a8] sm:$0xf0]  ;;  %v1527_v47 = vld [vmem:[#allocation5 + $0x198] sm:$0xf0] }
  0x5b   :  { %821 = vmatpush.bf16.msrb.mxu1 %v1654_v15  ;;  %v1883_v15 = vld [vmem:[#allocation5 + $0x134] sm:$0xf]  ;;  %v1881_v25 = vld [vmem:[#allocation5 + $0x124] sm:$0xf]  ;;  %v1455_v53 = vld [vmem:[#allocation5 + $0x108] sm:$0xf0] }
  0x5c   :  { %808 = vmatpush.bf16.msrb.mxu0 %v1582_v23  ;;  %v1482_v20 = vor.u32 %v1883_v15, %v1479_v16  ;;  %v1671_v23 = vld [vmem:[#allocation5 + $0x2b8] sm:$0xf0]  ;;  %v1897_v31 = vld [vmem:[#allocation5 + $0x1a4] sm:$0xf]  ;;  %v1927_v49 = vld [vmem:[#allocation5 + $0x294] sm:$0xf] }
  0x5d   :  { %863 = vmatpush.bf16.msra.mxu2 %v1402_v19  ;;  %v1899_v19 = vld [vmem:[#allocation5 + $0x1b4] sm:$0xf]  ;;  %v1674_v30 = vor.u32 %v1931_v22, %v1671_v23  ;;  %v1929_v34 = vld [vmem:[#allocation5 + $0x2a4] sm:$0xf]  ;;  %v1711_v58 = vld [vmem:[#allocation5 + $0x308] sm:$0xf0] }
  0x5e   :  { %850 = vmatpush.bf16.msrb.mxu3 %v1330_v27  ;;  %v1913_v27 = vld [vmem:[#allocation5 + $0x224] sm:$0xf]  ;;  %v1546_v29 = vor.u32 %v1899_v19, %v1543_v21  ;;  %v1666_v43 = vor.u32 %v1929_v34, %v1663_v35  ;;  %v1647_v5 = vld [vmem:[#allocation5 + $0x288] sm:$0xf0]  ;;  %v1943_v15 = vld [vmem:[#allocation8] sm:$0xff] }
  0x5f   :  { %822 = vmatpush.bf16.msrb.mxu1 %v1646_v33  ;;  %809 = vmatmul.bf16.vlgmr.msrb.gmra.mxu0 %v2288_v37  ;;  %v1535_v33 = vld [vmem:[#allocation5 + $0x1a8] sm:$0xf0]  ;;  %v1877_v52 = vld [vmem:[#allocation5 + $0x104] sm:$0xf] }
  0x60   :  { %871 = vmatpush.bf16.msra.mxu0 %v1514_v28  ;;  %v1599_v28 = vld [vmem:[#allocation5 + $0x228] sm:$0xf0]  ;;  %v1909_v55 = vld [vmem:[#allocation5 + $0x204] sm:$0xf]  ;;  %v1458_v62 = vor.u32 %v1877_v52, %v1455_v53  ;;  %v1952_v53 = vld [vmem:[#allocation8 + $0x48] sm:$0xff] }
  0x61   :  { %864 = vmatpush.bf16.msra.mxu2 %v1394_v38  ;;  %851 = vmatmul.bf16.vlgmr.msrb.gmra.mxu3 %v2274_v60  ;;  %v1682_v60 = vor.u32 %v1933_v11, %v1679_v12  ;;  %v1602_v36 = vor.u32 %v1913_v27, %v1599_v28  ;;  %v1879_v38 = vld [vmem:[#allocation5 + $0x114] sm:$0xf]  ;;  %v1893_v0 = vld [vmem:[#allocation5 + $0x184] sm:$0xf]  ;;  %v1948_v11 = vld [vmem:[#allocation8 + $0x28] sm:$0xff] }
  0x62   :  { %899 = vmatpush.bf16.msra.mxu3 %v1642_v32  ;;  %823 = vmatmul.bf16.vlgmr.msrb.gmra.mxu1 %v2290_v44  ;;  %v1474_v32 = vor.u32 %v1881_v25, %v1471_v26  ;;  %v1466_v46 = vor.u32 %v1879_v38, %v1463_v39  ;;  %v1925_v3 = vld [vmem:[#allocation5 + $0x284] sm:$0xf]  ;;  %v1947_v12 = vld [vmem:[#allocation8 + $0x20] sm:$0xff]  ;;  %v1958_v22 = vld [vmem:[#allocation8 + $0x78] sm:$0xff] }
  0x63   :  { %885 = vmatpush.bf16.msra.mxu1 %v1578_v41  ;;  %v1591_v41 = vld [vmem:[#allocation5 + $0x218] sm:$0xf0]  ;;  %v1949_v10 = vld [vmem:[#allocation8 + $0x30] sm:$0xff]  ;;  %v1955_v38 = vld [vmem:[#allocation8 + $0x60] sm:$0xff] }
  0x64   :  { %872 = vmatpush.bf16.msra.mxu0 %v1506_v45  ;;  %865 = vmatmul.bf16.vlgmr.msra.gmra.mxu2 %v2278_v4  ;;  %v1607_v4 = vld [vmem:[#allocation5 + $0x238] sm:$0xf0]  ;;  %v1895_v45 = vld [vmem:[#allocation5 + $0x194] sm:$0xf]  ;;  %v1594_v51 = vor.u32 %v1911_v40, %v1591_v41  ;;  %v1957_v27 = vld [vmem:[#allocation8 + $0x70] sm:$0xff] }
  0x65   :  { %913 = vmatpush.bf16.msrb.mxu2 %v1706_v42  ;;  %v1610_v24 = vor.u32 %v1915_v17, %v1607_v4  ;;  %v1538_v42 = vor.u32 %v1897_v31, %v1535_v33  ;;  %v1956_v33 = vld [vmem:[#allocation8 + $0x68] sm:$0xff] }
  0x66   :  { %900 = vmatpush.bf16.msra.mxu3 %v1634_v50  ;;  %v1655_v50 = vld [vmem:[#allocation5 + $0x298] sm:$0xf0] }
  0x67   :  { %886 = vmatpush.bf16.msra.mxu1 %v1570_v56  ;;  %v1583_v56 = vld [vmem:[#allocation5 + $0x208] sm:$0xf0]  ;;  %v1658_v61 = vor.u32 %v1927_v49, %v1655_v50  ;;  %v1953_v50 = vld [vmem:[#allocation8 + $0x50] sm:$0xff] }
  0x68   :  { %873 = vmatpush.bf16.msra.mxu0 %v1498_v59  ;;  %v1530_v59 = vor.u32 %v1895_v45, %v1527_v47  ;;  %v1586_v2 = vor.u32 %v1909_v55, %v1583_v56  ;;  %v1954_v45 = vld [vmem:[#allocation8 + $0x58] sm:$0xff]  ;;  %v1951_v56 = vld [vmem:[#allocation8 + $0x40] sm:$0xff] }
  0x69   :  { %914 = vmatpush.bf16.msrb.mxu2 %v1698_v57  ;;  %v1941_v57 = vld [vmem:[#allocation5 + $0x304] sm:$0xf] }
  0x6a   :  { %901 = vmatpush.bf16.msra.mxu3 %v1626_v1  ;;  %v1519_v1 = vld [vmem:[#allocation5 + $0x188] sm:$0xf0]  ;;  %v1714_v6 = vor.u32 %v1941_v57, %v1711_v58 }
  0x6b   :  { %887 = vmatpush.bf16.msra.mxu1 %v1562_v8  ;;  %v1522_v7 = vor.u32 %v1893_v0, %v1519_v1  ;;  %v1650_v8 = vor.u32 %v1925_v3, %v1647_v5 }
  0x6c   :  { %874 = vmatpush.bf16.msra.mxu0 %v1490_v13  ;;  %v1946_v13 = vld [vmem:[#allocation8 + $0x18] sm:$0xff] }
  0x6d   :  { %915 = vmatpush.bf16.msrb.mxu2 %v1690_v9  ;;  %v1950_v9 = vld [vmem:[#allocation8 + $0x38] sm:$0xff] }
  0x6e   :  { %902 = vmatpush.bf16.msra.mxu3 %v1618_v14 }
  0x6f   :  { %888 = vmatpush.bf16.msra.mxu1 %v1554_v18 }
  0x70   :  { %875 = vmatpush.bf16.msra.mxu0 %v1482_v20 }
  0x71   :  { %916 = vmatpush.bf16.msrb.mxu2 %v1682_v60 }
  0x72   :  { %903 = vmatpush.bf16.msra.mxu3 %v1610_v24 }
  0x73   :  { %889 = vmatpush.bf16.msra.mxu1 %v1546_v29 }
  0x74   :  { %876 = vmatpush.bf16.msra.mxu0 %v1474_v32 }
  0x75   :  { %917 = vmatpush.bf16.msrb.mxu2 %v1674_v30 }
  0x76   :  { %904 = vmatpush.bf16.msra.mxu3 %v1602_v36 }
  0x77   :  { %890 = vmatpush.bf16.msra.mxu1 %v1538_v42 }
  0x78   :  { %877 = vmatpush.bf16.msra.mxu0 %v1466_v46 }
  0x79   :  { %918 = vmatpush.bf16.msrb.mxu2 %v1666_v43 }
  0x7a   :  { %905 = vmatpush.bf16.msra.mxu3 %v1594_v51 }
  0x7b   :  { %891 = vmatpush.bf16.msra.mxu1 %v1530_v59 }
  0x7c   :  { %878 = vmatpush.bf16.msra.mxu0 %v1458_v62 }
  0x7d   :  { %919 = vmatpush.bf16.msrb.mxu2 %v1658_v61 }
  0x7e   :  { %906 = vmatpush.bf16.msra.mxu3 %v1586_v2 }
  0x7f   :  { %892 = vmatpush.bf16.msra.mxu1 %v1522_v7  ;;  %879 = vmatmul.bf16.vlgmr.msra.gmra.mxu0 %v2272_v54  ;;  %v1945_v54 = vld [vmem:[#allocation8 + $0x10] sm:$0xff] }
  0x80   :  { %934 = vmatpush.bf16.msrb.mxu0 %v1714_v6 }
  0x81   :  { %907 = vmatmul.bf16.vlgmr.msra.gmra.mxu3 %v2288_v37  ;;  %920 = vmatpush.bf16.msrb.mxu2 %v1650_v8  ;;  %v1944_v37 = vld [vmem:[#allocation8 + $0x8] sm:$0xff] }
  0x82   :  { %893 = vmatmul.bf16.vlgmr.msra.gmra.mxu1 %v2276_v63  ;;  %v245_v63 = vld [vmem:[#allocation7] sm:$0x3]  ;;  %1093 = vmatpush.bf16.msrb.mxu3 %v1958_v22  ;;  %v1963_v22 = vld [vmem:[#allocation10 + $0x20] sm:$0xff] }
  0x83   :  { %1079 = vmatpush.bf16.msrb.mxu1 %v1950_v9  ;;  %v248_v57 = vperm.slane %v245_v63, 1 }
  0x84   :  { %921 = vmatmul.bf16.vlgmr.msrb.gmra.mxu2 %v2290_v44 }
  0x86   :  { %1094 = vmatpush.bf16.msrb.mxu3 %v1957_v27  ;;  %v1974_v27 = vld [vmem:[#allocation11 + $0x38] sm:$0xff] }
  0x87   :  { %1080 = vmatpush.bf16.msrb.mxu1 %v1949_v10  ;;  %1263 = vmatpush.bf16.msra.mxu2 %v1974_v27 }
  0x8a   :  { %1095 = vmatpush.bf16.msrb.mxu3 %v1956_v33  ;;  %v1993_v33 = vld [vmem:[%s2321_s4] ss:$0 sm:$0xff] }
  0x8b   :  { %1081 = vmatpush.bf16.msrb.mxu1 %v1948_v11 }
  0x8e   :  { %1096 = vmatpush.bf16.msrb.mxu3 %v1955_v38 }
  0x8f   :  { %1716 = vmatmul.msk.bf16.vlgmr.msrb.gmra.mxu0 %vm741_vm0, %v2284_v48  ;;  %1082 = vmatpush.bf16.msrb.mxu1 %v1947_v12  ;;  %v247_v48 = vperm.slane %v245_v63, 0 }
  0x92   :  { %1097 = vmatpush.bf16.msrb.mxu3 %v1954_v45  ;;  %v1970_v45 = vld [vmem:[#allocation11 + $0x18] sm:$0xff] }
  0x93   :  { %1083 = vmatpush.bf16.msrb.mxu1 %v1946_v13 }
  0x96   :  { %1098 = vmatpush.bf16.msrb.mxu3 %v1953_v50 }
  0x97   :  { %1084 = vmatpush.bf16.msrb.mxu1 %v1945_v54 }
  0x9a   :  { %1099 = vmatpush.bf16.msrb.mxu3 %v1952_v53 }
  0x9b   :  { %1085 = vmatpush.bf16.msrb.mxu1 %v1944_v37 }
  0x9e   :  { %1100 = vmatpush.bf16.msrb.mxu3 %v1951_v56 }
  0x9f   :  { %1086 = vmatpush.bf16.msrb.mxu1 %v1943_v15 }
  0xbc   :  { %v754_v14 = vpop.f32.mrf.mxu0 }
  0xbd   :  { %v755_v17 = vadd.f32 %v754_v14, %v247_v48 }
  0xbf   :  { %v768_v16 = vpop.f32.mrf.mxu1 }
  0xc0   :  { %v769_v60 = vadd.f32 %v768_v16, %v755_v17 }
  0xc3   :  { %v782_v44 = vpop.f32.mrf.mxu2 }
  0xc4   :  { %v756_v4 = vpop.f32.mrf.mxu0  ;;  %v796_v19 = vpop.f32.mrf.mxu3  ;;  %v783_v23 = vadd.f32 %v782_v44, %v769_v60 }
  0xc5   :  { %v757_v21 = vadd.f32 %v756_v4, %v247_v48 }
  0xc6   :  { %v797_v28 = vadd.f32 %v796_v19, %v783_v23  ;;  %v1966_v19 = vld [vmem:[#allocation10 + $0x38] sm:$0xff] }
  0xc7   :  { %v770_v20 = vpop.f32.mrf.mxu1  ;;  %1178 = vmatpush.bf16.msra.mxu0 %v1966_v19  ;;  %v1962_v23 = vld [vmem:[#allocation10 + $0x18] sm:$0xff] }
  0xc8   :  { %v771_v24 = vadd.f32 %v770_v20, %v757_v21  ;;  %v1965_v20 = vld [vmem:[#allocation10 + $0x30] sm:$0xff]  ;;  %v1964_v21 = vld [vmem:[#allocation10 + $0x28] sm:$0xff] }
  0xcb   :  { %v784_v18 = vpop.f32.mrf.mxu2  ;;  %1179 = vmatpush.bf16.msra.mxu0 %v1965_v20 }
  0xcc   :  { %v785_v30 = vadd.f32 %v784_v18, %v771_v24  ;;  %v798_v32 = vpop.f32.mrf.mxu3  ;;  %v1961_v24 = vld [vmem:[#allocation10 + $0x10] sm:$0xff] }
  0xce   :  { %v799_v34 = vadd.f32 %v798_v32, %v785_v30  ;;  %v1971_v30 = vld [vmem:[#allocation11 + $0x20] sm:$0xff] }
  0xcf   :  { %1180 = vmatpush.bf16.msra.mxu0 %v1964_v21 }
  0xd3   :  { %v838_v26 = vpop.f32.mrf.mxu2  ;;  %1181 = vmatpush.bf16.msra.mxu0 %v1963_v22 }
  0xd7   :  { %1182 = vmatpush.bf16.msra.mxu0 %v1962_v23 }
  0xdb   :  { %v840_v41 = vpop.f32.mrf.mxu2  ;;  %1183 = vmatpush.bf16.msra.mxu0 %v1961_v24 }
  0xdc   :  { %v810_v25 = vpop.f32.mrf.mxu0 }
  0xdd   :  { %v811_v31 = vadd.f32 %v810_v25, %v797_v28  ;;  %v1960_v25 = vld [vmem:[#allocation10 + $0x8] sm:$0xff]  ;;  %v1973_v28 = vld [vmem:[#allocation11 + $0x30] sm:$0xff] }
  0xde   :  { %1264 = vmatpush.bf16.msra.mxu2 %v1973_v28 }
  0xdf   :  { %v824_v29 = vpop.f32.mrf.mxu1  ;;  %1184 = vmatpush.bf16.msra.mxu0 %v1960_v25 }
  0xe0   :  { %v825_v35 = vadd.f32 %v824_v29, %v811_v31  ;;  %v1972_v29 = vld [vmem:[#allocation11 + $0x28] sm:$0xff] }
  0xe2   :  { %v839_v42 = vadd.f32 %v838_v26, %v825_v35  ;;  %v1959_v26 = vld [vmem:[#allocation10] sm:$0xff]  ;;  %1265 = vmatpush.bf16.msra.mxu2 %v1972_v29 }
  0xe3   :  { %1185 = vmatpush.bf16.msra.mxu0 %v1959_v26 }
  0xe4   :  { %v812_v36 = vpop.f32.mrf.mxu0  ;;  %v941_v47 = vmax.f32 %v839_v42, 0.0  ;;  %v852_v52 = vpop.f32.mrf.mxu3 }
  0xe5   :  { %v813_v39 = vadd.f32 %v812_v36, %v799_v34  ;;  %v853_v62 = vadd.f32 %v852_v52, %v248_v57 }
  0xe6   :  { %1266 = vmatpush.bf16.msra.mxu2 %v1971_v30 }
  0xe7   :  { %v826_v40 = vpop.f32.mrf.mxu1  ;;  %v866_v55 = vpop.f32.mrf.mxu2 }
  0xe8   :  { %v827_v43 = vadd.f32 %v826_v40, %v813_v39  ;;  %v867_v1 = vadd.f32 %v866_v55, %v853_v62 }
  0xea   :  { %v841_v46 = vadd.f32 %v840_v41, %v827_v43  ;;  %1267 = vmatpush.bf16.msra.mxu2 %v1970_v45 }
  0xec   :  { %v943_v49 = vmax.f32 %v841_v46, 0.0  ;;  %v854_v58 = vpop.f32.mrf.mxu3  ;;  %v1969_v46 = vld [vmem:[#allocation11 + $0x10] sm:$0xff] }
  0xed   :  { %v855_v2 = vadd.f32 %v854_v58, %v248_v57 }
  0xee   :  { %v945_v51 = vpack.c.bf16 %v943_v49, %v941_v47  ;;  %1268 = vmatpush.bf16.msra.mxu2 %v1969_v46  ;;  %v1968_v47 = vld [vmem:[#allocation11 + $0x8] sm:$0xff]  ;;  %v1967_v49 = vld [vmem:[#allocation11] sm:$0xff] }
  0xef   :  { %v868_v61 = vpop.f32.mrf.mxu2 }
  0xf0   :  { %1087 = vmatmul.bf16.vlgmr.msrb.gmra.mxu1 %v945_v51  ;;  %v869_v7 = vadd.f32 %v868_v61, %v855_v2  ;;  %v1994_v51 = vld [vmem:[%s2323_s6] ss:$0 sm:$0xff]  ;;  %s2194_s6 = smov [#allocation13]  }
  0xf2   :  { %1269 = vmatpush.bf16.msra.mxu2 %v1968_v47 }
  0xf6   :  { %1270 = vmatpush.bf16.msra.mxu2 %v1967_v49 }
  0xfc   :  { %v880_v59 = vpop.f32.mrf.mxu0 }
  0xfd   :  { %v881_v8 = vadd.f32 %v880_v59, %v867_v1  ;;  %v1995_v59 = vld [vmem:[%s2325_s8] ss:$0 sm:$0xff]  ;;  %s1305_s8 = sshll.u32 %s2194_s6, 4  ;;  %s1306_s8 = int_to_ptr.vmem [resolvable:$true] %s1305_s8 }
  0xff   :  { %v894_v0 = vpop.f32.mrf.mxu1 }
 0x100   :  { %v895_v11 = vadd.f32 %v894_v0, %v881_v8 }
 0x104   :  { %v908_v3 = vpop.f32.mrf.mxu3  ;;  %v882_v5 = vpop.f32.mrf.mxu0 }
 0x105   :  { %v883_v9 = vadd.f32 %v882_v5, %v869_v7  ;;  %v909_v54 = vadd.f32 %v908_v3, %v895_v11 }
 0x107   :  { %v922_v6 = vpop.f32.mrf.mxu2  ;;  %v896_v10 = vpop.f32.mrf.mxu1 }
 0x108   :  { %v897_v37 = vadd.f32 %v896_v10, %v883_v9  ;;  %v923_v44 = vadd.f32 %v922_v6, %v909_v54 }
 0x10c   :  { %v910_v12 = vpop.f32.mrf.mxu3  ;;  %v936_v13 = vpop.f32.mrf.mxu0 }
 0x10d   :  { %v911_v63 = vadd.f32 %v910_v12, %v897_v37  ;;  %v937_v15 = vadd.f32 %v936_v13, %v923_v44 }
 0x10f   :  { %v924_v14 = vpop.f32.mrf.mxu2  ;;  %v942_v4 = vmax.f32 %v937_v15, 0.0 }
 0x110   :  { %v925_v16 = vadd.f32 %v924_v14, %v911_v63 }
 0x114   :  { %v938_v48 = vpop.f32.mrf.mxu0 }
 0x115   :  { %v939_v17 = vadd.f32 %v938_v48, %v925_v16 }
 0x117   :  { %v944_v18 = vmax.f32 %v939_v17, 0.0 }
 0x119   :  { %v946_v60 = vpack.c.bf16 %v944_v18, %v942_v4 }
 0x11b   :  { %1101 = vmatmul.bf16.vlgmr.msrb.gmra.mxu3 %v946_v60 }
 0x16d   :  { %v1088_v31 = vpop.f32.mrf.mxu1 }
 0x16e   :  { %v1089_v35 = vadd.f32 %v1993_v33, %v1088_v31 }
 0x175   :  { %v1090_v34 = vpop.f32.mrf.mxu1 }
 0x176   :  { %v1091_v36 = vadd.f32 %v1993_v33, %v1090_v34 }
 0x19e   :  { %v1102_v32 = vpop.f32.mrf.mxu3 }
 0x19f   :  { %v1103_v38 = vadd.f32 %v1102_v32, %v1089_v35 }
 0x1a1   :  { %v1107_v41 = vmax.f32 %v1103_v38, 0.0 }
 0x1a6   :  { %v1104_v39 = vpop.f32.mrf.mxu3 }
 0x1a7   :  { %v1105_v40 = vadd.f32 %v1104_v39, %v1091_v36 }
 0x1a9   :  { %v1108_v42 = vmax.f32 %v1105_v40, 0.0 }
 0x1ab   :  { %v1109_v43 = vpack.c.bf16 %v1108_v42, %v1107_v41 }
 0x1ad   :  { %1186 = vmatmul.bf16.vlgmr.msra.gmra.mxu0 %v1109_v43 }
 0x22a   :  { %v1187_v50 = vpop.f32.mrf.mxu0 }
 0x22b   :  { %v1188_v52 = vadd.f32 %v1994_v51, %v1187_v50 }
 0x22d   :  { %v1192_v56 = vmax.f32 %v1188_v52, 0.0 }
 0x232   :  { %v1189_v53 = vpop.f32.mrf.mxu0 }
 0x233   :  { %v1190_v55 = vadd.f32 %v1994_v51, %v1189_v53 }
 0x235   :  { %v1193_v57 = vmax.f32 %v1190_v55, 0.0 }
 0x237   :  { %v1194_v58 = vpack.c.bf16 %v1193_v57, %v1192_v56 }
 0x239   :  { %1271 = vmatmul.bf16.vlgmr.msra.gmra.mxu2 %v1194_v58 }
 0x2bc   :  { %v1272_v61 = vpop.f32.mrf.mxu2 }
 0x2bd   :  { %v1273_v62 = vadd.f32 %v1995_v59, %v1272_v61 }
 0x2bf   :  { %1277 = vmax.xlane.f32.xlu0 %v1273_v62 }
 0x2c4   :  { %v1274_v0 = vpop.f32.mrf.mxu2 }
 0x2c5   :  { %v1275_v1 = vadd.f32 %v1995_v59, %v1274_v0 }
 0x2c7   :  { %1279 = vmax.xlane.f32.xlu0 %v1275_v1 }
 0x332   :  { %v1278_v2 = vpop.xlane.xlu0 %1277 }
 0x333   :  { %v1281_v3 = vsub.f32 %v1273_v62, %v1278_v2 }
 0x335   :  { %v1283_v5 = vmul.f32 1.442695, %v1281_v3 }
 0x337   :  { %1996 = vpow2.f32 %v1283_v5 }
 0x33a   :  { %v1280_v6 = vpop.xlane.xlu0 %1279 }
 0x33b   :  { %v1282_v7 = vsub.f32 %v1275_v1, %v1280_v6 }
 0x33d   :  { %v1997_v8 = vpop.eup %1996  ;;  %v1285_v9 = vmul.f32 1.442695, %v1282_v7 }
 0x33e   :  { %1287 = vadd.xlane.f32.xlu1 %v1997_v8 }
 0x33f   :  { %1998 = vpow2.f32 %v1285_v9 }
 0x345   :  { %v1999_v10 = vpop.eup %1998 }
 0x346   :  { %1289 = vadd.xlane.f32.xlu1 %v1999_v10 }
 0x3b1   :  { %v1288_v11 = vpop.xlane.xlu1 %1287 }
 0x3b2   :  { %2000 = vlog2.f32 %v1288_v11 }
 0x3b8   :  { %v2001_v13 = vpop.eup %2000 }
 0x3b9   :  { %v1290_v12 = vpop.xlane.xlu1 %1289  ;;  %v1292_v54 = vmul.f32 0.6931472, %v2001_v13 }
 0x3ba   :  { %2002 = vlog2.f32 %v1290_v12 }
 0x3bb   :  { %v1295_v14 = vsub.f32 %v1281_v3, %v1292_v54 }
 0x3c0   :  { %v2003_v37 = vpop.eup %2002 }
 0x3c1   :  { %v1294_v63 = vmul.f32 0.6931472, %v2003_v37 }
 0x3c3   :  { %v1296_v44 = vsub.f32 %v1282_v7, %v1294_v63 }
 0x3c5   :  { %v1978_v15 = vpack.c.bf16 %v1296_v44, %v1295_v14 }
 0x3c7   :  { %1979 = vst [vmem:[#allocation13] sm:$0xff] %v1978_v15  }
 0x3c8   :  { %1313 = dma.vmem_to_hbm [thread:$0]  %s1306_s8, 128, %s1308_s3, [#allocation4], %s2186_s21, %s2186_s21, %s2187_s22  }
 0x3c9   :  { %2180 = dma.done.wait [#allocation4], 128  }
 0x3ca   :  { %2181 = vsyncadd [#allocation4], 4294967168 }
 0x3cb   :  { %1318 = vsyncpa [#allocation3], 1 }
 0x3cc   :  { %1319 = vsyncpa [#allocation6], 1 }
 0x3cd   :  { %1320 = vsyncpa [#allocation9], 1 }
 0x3ce   :  { %1321 = vsyncpa [#allocation12], 1 }
 0x3cf   :  { %1322 = vsyncpa [#allocation4], 1 }

</bundles_post_ra>
